<compile_context>
chip_gen: v6e
topology: v6e:2x2x1
jax: 0.10.0
libtpu: 0.0.40
codegen_flags: <defaults>
</compile_context>

<pallas_src>
import numpy as np
import jax
import jax.numpy as jnp
from jax.experimental import pallas as pl
from jax.experimental.pallas import tpu as pltpu


def _round_up(x, m):
    return ((x + m - 1) // m) * m


def _cdiv(a, b):
    return -(-a // b)


# ----------------------------- Pallas kernel ------------------------------ #
def _spconv_bn_relu_kernel(xg_ref, w_ref, shift_ref, o_ref):
    """Grid = (N_pad // TN,).  One fused matmul + BN-shift + ReLU per N tile.

    xg_ref:    (TN, Kc_pad)      bf16 gathered features (K folded into channels)
    w_ref:     (Kc_pad, Cout_p)  bf16 folded weight, BN scale pre-folded in
    shift_ref: (1, Cout_p)       f32 fused BN shift = beta - mean * scale
    o_ref:     (TN, Cout_p)      bf16 output tile
    """
    acc = jnp.dot(xg_ref[...], w_ref[...], preferred_element_type=jnp.float32)
    o_ref[...] = jnp.maximum(acc + shift_ref[...], 0.0).astype(o_ref.dtype)


def sparse_conv_bn_relu(xg, weight, shift, *, tn):
    """xg: (N_pad, Kc_pad) bf16, weight: (Kc_pad, Cout_p) bf16,
    shift: (1, Cout_p) f32.  Returns (N_pad, Cout_p) bf16."""
    N_pad, Kc_pad = xg.shape
    Cout_p = weight.shape[-1]
    assert N_pad % tn == 0
    grid = (N_pad // tn,)
    return pl.pallas_call(
        _spconv_bn_relu_kernel,
        out_shape=jax.ShapeDtypeStruct((N_pad, Cout_p), jnp.bfloat16),
        grid_spec=pltpu.PrefetchScalarGridSpec(
            num_scalar_prefetch=0,
            grid=grid,
            in_specs=[
                # gathered features: tile over N, full (folded) channel dim
                pl.BlockSpec((tn, Kc_pad), lambda n: (n, 0)),
                # folded weight: grid-invariant -> VMEM-resident
                pl.BlockSpec((Kc_pad, Cout_p), lambda n: (0, 0)),
                # fused BN shift: grid-invariant
                pl.BlockSpec((1, Cout_p), lambda n: (0, 0)),
            ],
            out_specs=pl.BlockSpec((tn, Cout_p), lambda n: (n, 0)),
        ),
        compiler_params=pltpu.CompilerParams(
            dimension_semantics=("parallel",),
        ),
    )(xg, weight, shift)


def _choose_tn(n, kc_pad, cout_p, *, tn_cap=2048, vmem_budget=8 << 20):
    """Largest power-of-two tile (<= cap) whose double-buffered streaming
    tiles fit an 8 MiB VMEM budget (safe under every generation's default
    scoped limit), while keeping at least 2 grid steps so
    dimension_semantics=('parallel',) can shard across v7x's two TCs."""
    per_row = 2 * (kc_pad * 2 + cout_p * 2)   # 2 buffers x (bf16 in + bf16 out)
    tn = tn_cap
    while tn > 16 and tn * per_row > vmem_budget:
        tn //= 2
    while tn > 16 and _cdiv(n, tn) < 2:
        tn //= 2
    return max(tn, 16)


# ------------------------------- glue / host ------------------------------- #
def build_kernel_map(coords, ks=3, stride=1, dilation=1):
    """For each output point, index of the input point at coord + offset,
    or -1 if absent.  stride=1 => output coords == input coords (torchsparse).

    coords: (N, 4) int numpy array [batch, x, y, z]
    returns nbr_idx: (N, K) int32, K = ks**3
    """
    assert stride == 1  # TODO(synk): strided coord downsampling not implemented
    N = coords.shape[0]
    table = {tuple(int(v) for v in c): i for i, c in enumerate(coords)}
    r = ks // 2
    offsets = [
        (dx * dilation, dy * dilation, dz * dilation)
        for dx in range(-r, r + 1)
        for dy in range(-r, r + 1)
        for dz in range(-r, r + 1)
    ]
    K = len(offsets)
    nbr = np.full((N, K), -1, dtype=np.int32)
    for i, c in enumerate(coords):
        b, x, y, z = (int(v) for v in c)
        for k, (dx, dy, dz) in enumerate(offsets):
            j = table.get((b, x + dx, y + dy, z + dz))
            if j is not None:
                nbr[i, k] = j
    return nbr


def sparse_conv3d_forward(feats, nbr_idx, weight, gamma, beta, run_mean, run_var,
                          eps=1e-5, tn=None):
    """Full SparseConv3d forward (conv + BN(eval) + ReLU).

    feats: (N, Cin), nbr_idx: (N, K), weight: (K, Cin, Cout)
    returns out (N, Cout) in bfloat16.
    """
    N, Cin = feats.shape
    K = nbr_idx.shape[1]
    Cout = weight.shape[-1]
    Kc = K * Cin

    # Contraction dim padded to 128 (folded into the gather below when
    # Cin | 128, i.e. for free).  Cout stays UNPADDED when small: the masked
    # narrow store costs far less than writing 16x padding bytes.
    Kc_pad = _round_up(Kc, 128)
    Cout_p = Cout if Cout < 64 else _round_up(Cout, 128)

    if tn is None:
        tn = _choose_tn(N, Kc_pad, Cout_p)
    N_pad = _round_up(N, tn)

    # --- host-side gather: single pass, bf16, all padding folded in -------
    feats_bf = feats.astype(jnp.bfloat16)
    x_aug = jnp.concatenate([feats_bf, jnp.zeros((1, Cin), jnp.bfloat16)], axis=0)
    safe_idx = jnp.where(nbr_idx < 0, N, nbr_idx).astype(jnp.int32)   # (N, K)

    if Kc_pad % Cin == 0:
        K2 = Kc_pad // Cin       # pad #offsets so the take yields Kc_pad directly
    else:
        K2 = K                   # rare fallback: pad the slab afterwards
    idx_full = jnp.full((N_pad, K2), N, dtype=jnp.int32)   # zero-row index
    idx_full = idx_full.at[:N, :K].set(safe_idx)
    xg = jnp.take(x_aug, idx_full, axis=0).reshape(N_pad, K2 * Cin)   # bf16 slab
    if K2 * Cin != Kc_pad:
        xg = jnp.pad(xg, ((0, 0), (0, Kc_pad - K2 * Cin)))

    # --- weight prep: fold BN scale into the f32 weight, then cast --------
    scale = gamma / jnp.sqrt(run_var + eps)                 # (Cout,)
    shift = beta - run_mean * scale
    w2 = (weight * scale).reshape(Kc, Cout)                 # f32, scale folded
    w2 = jnp.pad(w2, ((0, Kc_pad - Kc), (0, Cout_p - Cout))).astype(jnp.bfloat16)
    shift_p = jnp.pad(shift, (0, Cout_p - Cout)).reshape(1, Cout_p).astype(jnp.float32)

    out = sparse_conv_bn_relu(xg, w2, shift_p, tn=tn)       # (N_pad, Cout_p) bf16
    return out[:N, :Cout]


# ---------------------------------- main ----------------------------------- #
if __name__ == "__main__":
    inc, outc, ks = 4, 8, 3
    K = ks ** 3

    # deterministic sparse coordinates: 2 batches, unique voxels in [0, 10)^3
    rng = np.random.default_rng(0)
    coords_list = []
    for b in range(2):
        pts = rng.integers(0, 10, size=(160, 3))
        pts = np.unique(pts, axis=0)[:100]
        bcol = np.full((pts.shape[0], 1), b, dtype=np.int64)
        coords_list.append(np.concatenate([bcol, pts], axis=1))
    coords = np.concatenate(coords_list, axis=0)             # (N, 4)
    N = coords.shape[0]

    # deterministic features and parameters
    key = jax.random.PRNGKey(0)
    kf, kw, kg, kb, km, kv = jax.random.split(key, 6)
    feats = jax.random.normal(kf, (N, inc), dtype=jnp.float32)
    weight = jax.random.normal(kw, (K, inc, outc), dtype=jnp.float32) * 0.1
    gamma = 1.0 + 0.1 * jax.random.normal(kg, (outc,), dtype=jnp.float32)
    beta = 0.1 * jax.random.normal(kb, (outc,), dtype=jnp.float32)
    run_mean = 0.1 * jax.random.normal(km, (outc,), dtype=jnp.float32)
    run_var = 1.0 + 0.1 * jax.random.uniform(kv, (outc,), dtype=jnp.float32)

    nbr_idx = jnp.asarray(build_kernel_map(coords, ks=ks, stride=1, dilation=1))

    out = sparse_conv3d_forward(feats, nbr_idx, weight, gamma, beta,
                                run_mean, run_var)
    out = jax.block_until_ready(out)

    # Pure f32 reference (true module numerics).  Kernel runs bf16-in /
    # f32-accumulate / bf16-out, so compare with a loose tolerance.
    x_aug = jnp.concatenate([feats, jnp.zeros((1, inc), jnp.float32)], axis=0)
    safe = jnp.where(nbr_idx < 0, N, nbr_idx)
    xg_ref = jnp.take(x_aug, safe, axis=0).reshape(N, K * inc)
    conv_ref = xg_ref @ weight.reshape(K * inc, outc)
    scale_ref = gamma / jnp.sqrt(run_var + 1e-5)
    ref = jnp.maximum(conv_ref * scale_ref + (beta - run_mean * scale_ref), 0.0)

    assert out.shape == (N, outc)
    np.testing.assert_allclose(np.asarray(out, dtype=np.float32), np.asarray(ref),
                               rtol=5e-2, atol=5e-2)

    print("KERNEL_OK")
</pallas_src>

<mosaic_0001>
module attributes {stable_mosaic.version = 11 : i64} {
  func.func @_spconv_bn_relu_kernel(%arg0: i32, %arg1: memref<128x128xbf16, #tpu.memory_space<vmem>>, %arg2: memref<128x8xbf16, #tpu.memory_space<vmem>>, %arg3: memref<1x8xf32, #tpu.memory_space<vmem>>, %arg4: memref<128x8xbf16, #tpu.memory_space<vmem>>) attributes {dimension_semantics = [#tpu.dimension_semantics<parallel>], iteration_bounds = array<i64: 2>, scalar_prefetch = 0 : i64, scratch_operands = 0 : i64, tpu.core_type = #tpu.core_type<tc>, window_params = [{transform_indices = @transform_0, window_bounds = array<i64: 128, 128>}, {pipeline_mode = #tpu.pipeline_mode<synchronous>, transform_indices = @transform_1, window_bounds = array<i64: 128, 8>}, {pipeline_mode = #tpu.pipeline_mode<synchronous>, transform_indices = @transform_2, window_bounds = array<i64: 1, 8>}, {transform_indices = @transform_3, window_bounds = array<i64: 128, 8>}]} {
    %c0 = arith.constant 0 : index
    %c0_0 = arith.constant 0 : index
    %0 = vector.load %arg1[%c0, %c0_0] : memref<128x128xbf16, #tpu.memory_space<vmem>>, vector<128x128xbf16>
    %c0_1 = arith.constant 0 : index
    %c0_2 = arith.constant 0 : index
    %1 = vector.load %arg2[%c0_1, %c0_2] : memref<128x8xbf16, #tpu.memory_space<vmem>>, vector<128x8xbf16>
    %cst = arith.constant dense<0.000000e+00> : vector<128x8xf32>
    %2 = tpu.matmul %0, %1, %cst {dimension_numbers = #tpu.dot_dimension_numbers<[1], [0], [0], [1], [0, 0, 1, 1], [], []>} : vector<128x128xbf16>, vector<128x8xbf16>, vector<128x8xf32> -> vector<128x8xf32>
    %c0_3 = arith.constant 0 : index
    %c0_4 = arith.constant 0 : index
    %3 = vector.load %arg3[%c0_3, %c0_4] : memref<1x8xf32, #tpu.memory_space<vmem>>, vector<1x8xf32>
    %4 = vector.broadcast %3 : vector<1x8xf32> to vector<128x8xf32>
    %5 = arith.addf %2, %4 : vector<128x8xf32>
    %cst_5 = arith.constant 0.000000e+00 : f32
    %6 = vector.broadcast %cst_5 : f32 to vector<128x8xf32>
    %7 = arith.maximumf %5, %6 : vector<128x8xf32>
    %8 = arith.truncf %7 : vector<128x8xf32> to vector<128x8xbf16>
    %c0_6 = arith.constant 0 : index
    %c0_7 = arith.constant 0 : index
    %9 = vector.load %arg4[%c0_6, %c0_7] : memref<128x8xbf16, #tpu.memory_space<vmem>>, vector<128x8xbf16>
    tpu.vector_store %arg4[%c0_6, %c0_7], %8 {strides = array<i32>} : memref<128x8xbf16, #tpu.memory_space<vmem>>, vector<128x8xbf16>,
    return
  }
  func.func @transform_0(%arg0: i32) -> (i32, i32) {
    %c0_i32 = arith.constant 0 : i32
    %c0_i32_0 = arith.constant 0 : i32
    return %arg0, %c0_i32 : i32, i32
  }
  func.func @transform_1(%arg0: i32) -> (i32, i32) {
    %c0_i32 = arith.constant 0 : i32
    %c0_i32_0 = arith.constant 0 : i32
    %c0_i32_1 = arith.constant 0 : i32
    return %c0_i32, %c0_i32_0 : i32, i32
  }
  func.func @transform_2(%arg0: i32) -> (i32, i32) {
    %c0_i32 = arith.constant 0 : i32
    %c0_i32_0 = arith.constant 0 : i32
    %c0_i32_1 = arith.constant 0 : i32
    return %c0_i32, %c0_i32_0 : i32, i32
  }
  func.func @transform_3(%arg0: i32) -> (i32, i32) {
    %c0_i32 = arith.constant 0 : i32
    %c0_i32_0 = arith.constant 0 : i32
    return %arg0, %c0_i32 : i32, i32
  }
}

</mosaic_0001>

<bundles_post_ra>
// kernel: tpu_custom_call.1
= control target key start
LH: loop header
LB: loop body
LE: loop exit
PB: predicated region body
PF: predicated region fallthrough
CT: control target
= control target key end

     0   :  { %8 = vsyncpa [#allocation3], 0  ;;  %s1050_s0 = inlined_call_operand.hbm [shape: bf16[256,128], index: 0, kind: input, shape index: {}]   ;;  %s1051_s1 = inlined_call_operand.vmem [shape: bf16[128,8], index: 1, kind: input, shape index: {}]   ;;  %s1052_s2 = inlined_call_operand.vmem [shape: f32[1,8], index: 2, kind: input, shape index: {}]   ;;  %s1053_s3 = inlined_call_operand.vmem [shape: bf16[256,8], index: 3, kind: output, shape index: {}]  }
   0x1   :  { %10 = vsyncpa [#allocation3 + $0x1], 0  ;;  %s861_s12 = smov 0   ;;  %s863_s13 = smov 0  }
   0x2   :  { %s865_s14 = smov 0   ;;  %s867_s15 = smov 0  }
   0x3 LB: > { %s590_s16 = sadd.s32 4294967295, %s836_s15   ;;  %s881_s17 = sadd.s32 1, %s836_s15   ;;  %s836_s15 = sphi %s867_s15, %s1062_s15   ;;  %s832_s14 = sphi %s865_s14, %s1061_s14   ;;  %s828_s13 = sphi %s863_s13, %s1060_s13   ;;  %s824_s12 = sphi %s861_s12, %s1059_s12  }
   0x4   : > { %s20_s18 = ssub.s32 %s836_s15, %s881_s17  ;;  %s23_s19 = sadd.s32 1, %s832_s14 }
   0x5   : > { %p21_p0 = scmp.eq.s32.totalorder %s20_s18, 0  ;;  %p30_p1 = scmp.ne.s32.totalorder %s832_s14, %s828_s13 }
   0x6   : > { %p31_p2 = scmp.eq.s32.totalorder %s836_s15, 0  ;;  %p36_p3 = scmp.ne.s32.totalorder %s828_s13, %s824_s12 }
   0x7   : > { %s891_s20 = scalar_select %p21_p0, %s832_s14, %s23_s19  }
   0x8   : > { %p32_p4 = por %p31_p2, %p30_p1  ;;  %p37_p5 = scmp.eq.s32.totalorder %s590_s16, 0 }
   0x9   : > { %p723_p6 = scmp.lt.s32.totalorder %s836_s15, 2  ;;  %s134_s22 = sand.u32 1, %s832_s14  }
   0xa   : > { %p896_p7 = por %p37_p5, %p36_p3  ;;  %s594_s23 = sshll.u32 %s134_s22, 6 }
   0xb   : > { %s636_s24 = sshll.u32 %s836_s15, 10  ;;  %s138_s28 = scalar_lea.vmem [#allocation2], %s594_s23 }
   0xc   : > { %s1055_s21 = scalar_select %p896_p7, 1, 0 }
   0xd   : > { %s905_s27 = scalar_lea.hbm %s1050_s0, %s636_s24  ;;  %s145_s29 = sshll.u32 %s138_s28, 4  ;;  %s907_s29 = int_to_ptr.vmem [resolvable:$true] %s145_s29 }
   0xe   : > { %p909_p8 = pnand %p723_p6, %p32_p4  ;;  %s914_s4 = scalar_lea.sflag [#allocation3], %s134_s22 }
   0xf   : > { %s774_s5 = scalar_lea.hbm %s905_s27, 1024  ;;  %s779_s8 = scalar_lea.hbm %s1050_s0, 2048 }
  0x10   : > { %p775_p10 = scmp.ne.s32.totalorder %s905_s27, %s774_s5  ;;  %p776_p11 = pneg %p909_p8 }
  0x11   : > { %p780_p0 = scmp.lt.s32.totalorder %s905_s27, %s1050_s0  ;;  %p781_p1 = scmp.lt.s32.totalorder %s779_s8, %s774_s5 }
  0x12   : > { %p777_p12 = pnand %p776_p11, %p775_p10 }
  0x13   : > { %p782_p2 = por %p781_p1, %p780_p0 }
  0x14   : > { %p778_p13 = pneg %p777_p12 }
  0x16   : > { %p783_p3 = pnand %p782_p2, %p778_p13 }
  0x18   : > { %786 = shalt.err (!%p783_p3)
}
  0x19   : > { %s787_s11 = scalar_lea.vmem %s907_s29, 1024  ;;  %s838_s12 = smov [#allocation2]  }
  0x1a   : > { %p788_p4 = scmp.ne.s32.totalorder %s907_s29, %s787_s11  ;;  %s792_s18 = sshll.u32 %s838_s12, 4  ;;  %s793_s18 = int_to_ptr.vmem [resolvable:$false] %s792_s18 }
  0x1b   : > { %s794_s19 = scalar_lea.vmem %s793_s18, 2048  ;;  %p795_p10 = scmp.lt.s32.totalorder %s907_s29, %s793_s18 }
  0x1c   : > { %p790_p5 = pnand %p788_p4, %p776_p11  ;;  %p796_p12 = scmp.lt.s32.totalorder %s794_s19, %s787_s11 }
  0x1e   : > { %p791_p6 = pneg %p790_p5  ;;  %p797_p9 = por %p796_p12, %p795_p10 }
  0x20   : > { %p798_p7 = pnand %p797_p9, %p791_p6 }
  0x22   : > { %801 = shalt.err (!%p798_p7)
}
  0x23   : > { %s839_s22 = smov 64   ;;  %s840_s23 = smov 4  }
  0x24   : > { %722 = dma.hbm_to_vmem [thread:$0]  (!%p909_p8), %s905_s27, 1024, %s907_s29, %s914_s4, %s839_s22, %s839_s22, %s840_s23  }
  0x25   : > { %p153_p11 = scmp.lt.s32.totalorder %s836_s15, 3  ;;  %p1057_p13 = scmp.ge.s32.totalorder %s836_s15, 1 }
  0x27   : > { %p154_p0 = pnand %p1057_p13, %p153_p11 }
  0x28   : > { %s159_s24 = sand.u32 (!%p154_p0), 1, %s828_s13   ;;  %p1058_p7 = scmp.ne.s32.totalorder (!%p154_p0), %s1055_s21, 0 }
  0x29   : > { %157 = sbr.rel (%p154_p0) target bundleno = 294 (0x126), region = 32  ;;  %s598_s25 = sshll.u32 (!%p154_p0), %s159_s24, 6 }
  0x2a   : > { %s160_s26 = scalar_lea.sflag (!%p154_p0), [#allocation3], %s159_s24  ;;  %s939_s28 = scalar_lea.vmem (!%p154_p0), [#allocation2], %s598_s25 }
  0x2e   : > { %819 = dma.done.wait (%p1058_p7), %s160_s26, 1024  }
  0x2f   : > { %821 = vsyncadd (%p1058_p7), %s160_s26, 4294966272  ;;  %v758_v0 = vld [vmem:[%s1051_s1 + $0x38] sm:$0xff]   ;;  %v759_v1 = vld [vmem:[%s1051_s1 + $0x30] sm:$0xff]   ;;  %s599_s23 = sshll.u32 %s590_s16, 4  ;;  %vm506_vm0 = vcmask 60416  }
  0x30   : > { %669 = vmatprep.subr.bf16.mxu0 %v758_v0  ;;  %701 = vmatprep.subr.bf16.mxu1 %v758_v0  ;;  %v760_v2 = vld [vmem:[%s1051_s1 + $0x28] sm:$0xff]   ;;  %v761_v3 = vld [vmem:[%s1051_s1 + $0x20] sm:$0xff]   ;;  %v762_v6 = vld [vmem:[%s1051_s1 + $0x18] sm:$0xff]   ;;  %p188_p8 = scmp.lt.s32.totalorder %s599_s23, 31 }
  0x31   : > { %670 = vmatpush3.bf16.msra.mxu0 %v758_v0  ;;  %709 = vmatpush3.bf16.msra.mxu1 %v758_v0  ;;  %v766_v4 = vld [vmem:[%s939_s28] sm:$0xff]   ;;  %v763_v7 = vld [vmem:[%s1051_s1 + $0x10] sm:$0xff]   ;;  %v764_v8 = vld [vmem:[%s1051_s1 + $0x8] sm:$0xff]  }
  0x32   : > { %671 = vmatprep.subr.bf16.mxu0 %v759_v1  ;;  %702 = vmatprep.subr.bf16.mxu1 %v759_v1  ;;  %v767_v5 = vld [vmem:[%s939_s28 + $0x20] sm:$0xff]   ;;  %v768_v10 = vld [vmem:[%s939_s28 + $0x8] sm:$0xff]   ;;  %v770_v12 = vld [vmem:[%s939_s28 + $0x10] sm:$0xff]   ;;  %s1064_s23 = smov (!%p188_p8, %s599_s23), 31 }
  0x33   : > { %685 = vmatprep.mubr.bf16.mxu0 %v766_v4  ;;  %693 = vmatprep.mubr.bf16.mxu1 %v767_v5  ;;  %v765_v9 = vld [vmem:[%s1051_s1] sm:$0xff]   ;;  %v769_v11 = vld [vmem:[%s939_s28 + $0x28] sm:$0xff]   ;;  %v771_v13 = vld [vmem:[%s939_s28 + $0x30] sm:$0xff]   ;;  %s600_s26 = sshll.u32 %s1064_s23, 2 }
  0x34   : > { %v772_v14 = vld [vmem:[%s939_s28 + $0x18] sm:$0xff]   ;;  %v982_v16 = vld [vmem:[%s1052_s2] ss:$0 sm:$0xff] }
  0x35   : > { %672 = vmatpush3.bf16.msra.mxu0 %v759_v1  ;;  %710 = vmatpush3.bf16.msra.mxu1 %v759_v1  ;;  %v773_v15 = vld [vmem:[%s939_s28 + $0x38] sm:$0xff]   ;;  %s991_s28 = scalar_lea.vmem %s1053_s3, %s600_s26 }
  0x36   : > { %673 = vmatprep.subr.bf16.mxu0 %v760_v2  ;;  %703 = vmatprep.subr.bf16.mxu1 %v760_v2 }
  0x39   : > { %674 = vmatpush3.bf16.msra.mxu0 %v760_v2  ;;  %711 = vmatpush3.bf16.msra.mxu1 %v760_v2 }
  0x3a   : > { %675 = vmatprep.subr.bf16.mxu0 %v761_v3  ;;  %704 = vmatprep.subr.bf16.mxu1 %v761_v3 }
  0x3d   : > { %676 = vmatpush3.bf16.msra.mxu0 %v761_v3  ;;  %712 = vmatpush3.bf16.msra.mxu1 %v761_v3 }
  0x3e   : > { %677 = vmatprep.subr.bf16.mxu0 %v762_v6  ;;  %705 = vmatprep.subr.bf16.mxu1 %v762_v6 }
  0x41   : > { %678 = vmatpush3.bf16.msra.mxu0 %v762_v6  ;;  %713 = vmatpush3.bf16.msra.mxu1 %v762_v6 }
  0x42   : > { %679 = vmatprep.subr.bf16.mxu0 %v763_v7  ;;  %706 = vmatprep.subr.bf16.mxu1 %v763_v7 }
  0x45   : > { %680 = vmatpush3.bf16.msra.mxu0 %v763_v7  ;;  %714 = vmatpush3.bf16.msra.mxu1 %v763_v7 }
  0x46   : > { %681 = vmatprep.subr.bf16.mxu0 %v764_v8  ;;  %707 = vmatprep.subr.bf16.mxu1 %v764_v8 }
  0x49   : > { %682 = vmatpush3.bf16.msra.mxu0 %v764_v8  ;;  %715 = vmatpush3.bf16.msra.mxu1 %v764_v8 }
  0x4a   : > { %683 = vmatprep.subr.bf16.mxu0 %v765_v9  ;;  %708 = vmatprep.subr.bf16.mxu1 %v765_v9 }
  0x4d   : > { %684 = vmatpush3.bf16.msra.mxu0 %v765_v9  ;;  %716 = vmatpush3.bf16.msra.mxu1 %v765_v9 }
  0x50   : > { %686 = vmatmul.mubr.bf16.vlgmr.msra.gmra.mxu0 %v768_v10  ;;  %694 = vmatmul.mubr.bf16.vlgmr.msra.gmra.mxu1 %v769_v11 }
  0x51   : > { %689 = vmatprep.mubr.bf16.mxu0 %v770_v12  ;;  %697 = vmatprep.mubr.bf16.mxu1 %v771_v13 }
  0x58   : > { %690 = vmatmul.mubr.bf16.gmra.mxu0 %v772_v14  ;;  %698 = vmatmul.mubr.bf16.gmra.mxu1 %v773_v15 }
 0x110   : > { %v687_v17 = vpop.f32.mrf.mxu0  ;;  %v695_v18 = vpop.f32.mrf.mxu1 }
 0x111   : > { %v372_v19 = vadd.f32 %v687_v17, %v982_v16  ;;  %v404_v20 = vadd.f32 %v695_v18, %v982_v16 }
 0x112   : > { %v363_v21 = vpop.f32.mrf.mxu0  ;;  %v395_v22 = vpop.f32.mrf.mxu1 }
 0x113   : > { %v428_v23 = vmax.f32 %v372_v19, 0.0  ;;  %v436_v24 = vmax.f32 %v404_v20, 0.0  ;;  %v364_v25 = vadd.f32 %v982_v16, %v363_v21  ;;  %v396_v26 = vadd.f32 %v982_v16, %v395_v22 }
 0x114   : > { %v688_v27 = vpop.f32.mrf.mxu0  ;;  %v696_v28 = vpop.f32.mrf.mxu1 }
 0x115   : > { %v639_v29 = vpack.c.bf16 %v428_v23, %v428_v23  ;;  %v647_v30 = vpack.c.bf16 %v436_v24, %v436_v24  ;;  %v426_v31 = vmax.f32 %v364_v25, 0.0  ;;  %v434_v32 = vmax.f32 %v396_v26, 0.0 }
 0x116   : > { %v375_v33 = vadd.f32 %v688_v27, %v982_v16  ;;  %v407_v34 = vadd.f32 %v696_v28, %v982_v16  ;;  %v366_v35 = vpop.f32.mrf.mxu0  ;;  %v398_v36 = vpop.f32.mrf.mxu1 }
 0x117   : > { %509 = vst.msk [vmem:[%s991_s28 + $0x8] sm:$0xf] %vm506_vm0, %v639_v29  ;;  %517 = vst.msk [vmem:[%s991_s28 + $0x28] sm:$0xf] %vm506_vm0, %v647_v30  ;;  %v637_v37 = vpack.c.bf16 %v426_v31, %v426_v31  ;;  %v645_v38 = vpack.c.bf16 %v434_v32, %v434_v32  ;;  %v367_v39 = vadd.f32 %v982_v16, %v366_v35 }
 0x118   : > { %v399_v40 = vadd.f32 %v982_v16, %v398_v36  ;;  %v429_v41 = vmax.f32 %v375_v33, 0.0  ;;  %v437_v42 = vmax.f32 %v407_v34, 0.0  ;;  %v691_v43 = vpop.f32.mrf.mxu0  ;;  %v699_v44 = vpop.f32.mrf.mxu1 }
 0x119   : > { %507 = vst.msk [vmem:[%s991_s28] sm:$0xf] %vm506_vm0, %v637_v37  ;;  %515 = vst.msk [vmem:[%s991_s28 + $0x20] sm:$0xf] %vm506_vm0, %v645_v38  ;;  %v427_v45 = vmax.f32 %v367_v39, 0.0  ;;  %v388_v47 = vadd.f32 %v691_v43, %v982_v16  ;;  %v420_v48 = vadd.f32 %v699_v44, %v982_v16 }
 0x11a   : > { %v435_v46 = vmax.f32 %v399_v40, 0.0  ;;  %v640_v49 = vpack.c.bf16 %v429_v41, %v429_v41  ;;  %v648_v50 = vpack.c.bf16 %v437_v42, %v437_v42  ;;  %v379_v51 = vpop.f32.mrf.mxu0  ;;  %v411_v52 = vpop.f32.mrf.mxu1 }
 0x11b   : > { %v638_v53 = vpack.c.bf16 %v427_v45, %v427_v45  ;;  %v432_v55 = vmax.f32 %v388_v47, 0.0  ;;  %v440_v56 = vmax.f32 %v420_v48, 0.0  ;;  %v380_v57 = vadd.f32 %v982_v16, %v379_v51 }
 0x11c   : > { %v646_v54 = vpack.c.bf16 %v435_v46, %v435_v46  ;;  %510 = vst.msk [vmem:[%s991_s28 + $0xc] sm:$0xf] %vm506_vm0, %v640_v49  ;;  %518 = vst.msk [vmem:[%s991_s28 + $0x2c] sm:$0xf] %vm506_vm0, %v648_v50  ;;  %v412_v58 = vadd.f32 %v982_v16, %v411_v52  ;;  %v692_v59 = vpop.f32.mrf.mxu0  ;;  %v700_v60 = vpop.f32.mrf.mxu1 }
 0x11d   : > { %508 = vst.msk [vmem:[%s991_s28 + $0x4] sm:$0xf] %vm506_vm0, %v638_v53  ;;  %v643_v61 = vpack.c.bf16 %v432_v55, %v432_v55  ;;  %v651_v62 = vpack.c.bf16 %v440_v56, %v440_v56  ;;  %v391_v63 = vadd.f32 %v692_v59, %v982_v16  ;;  %v423_v0 = vadd.f32 %v700_v60, %v982_v16 }
 0x11e   : > { %516 = vst.msk [vmem:[%s991_s28 + $0x24] sm:$0xf] %vm506_vm0, %v646_v54  ;;  %v430_v1 = vmax.f32 %v380_v57, 0.0  ;;  %v438_v2 = vmax.f32 %v412_v58, 0.0  ;;  %v382_v3 = vpop.f32.mrf.mxu0  ;;  %v414_v4 = vpop.f32.mrf.mxu1 }
 0x11f   : > { %513 = vst.msk [vmem:[%s991_s28 + $0x18] sm:$0xf] %vm506_vm0, %v643_v61  ;;  %521 = vst.msk [vmem:[%s991_s28 + $0x38] sm:$0xf] %vm506_vm0, %v651_v62  ;;  %v433_v5 = vmax.f32 %v391_v63, 0.0  ;;  %v441_v6 = vmax.f32 %v423_v0, 0.0  ;;  %v383_v7 = vadd.f32 %v982_v16, %v382_v3  ;;  %v415_v8 = vadd.f32 %v982_v16, %v414_v4 }
 0x120   : > { %v641_v9 = vpack.c.bf16 %v430_v1, %v430_v1  ;;  %v649_v10 = vpack.c.bf16 %v438_v2, %v438_v2 }
 0x121   : > { %v644_v11 = vpack.c.bf16 %v433_v5, %v433_v5  ;;  %v652_v12 = vpack.c.bf16 %v441_v6, %v441_v6  ;;  %v431_v13 = vmax.f32 %v383_v7, 0.0  ;;  %v439_v14 = vmax.f32 %v415_v8, 0.0 }
 0x122   : > { %511 = vst.msk [vmem:[%s991_s28 + $0x10] sm:$0xf] %vm506_vm0, %v641_v9  ;;  %519 = vst.msk [vmem:[%s991_s28 + $0x30] sm:$0xf] %vm506_vm0, %v649_v10 }
 0x123   : > { %514 = vst.msk [vmem:[%s991_s28 + $0x1c] sm:$0xf] %vm506_vm0, %v644_v11  ;;  %522 = vst.msk [vmem:[%s991_s28 + $0x3c] sm:$0xf] %vm506_vm0, %v652_v12  ;;  %v642_v15 = vpack.c.bf16 %v431_v13, %v431_v13  ;;  %v650_v17 = vpack.c.bf16 %v439_v14, %v439_v14 }
 0x125   : > { %512 = vst.msk [vmem:[%s991_s28 + $0x14] sm:$0xf] %vm506_vm0, %v642_v15  ;;  %520 = vst.msk [vmem:[%s991_s28 + $0x34] sm:$0xf] %vm506_vm0, %v650_v17 }
 0x126 PF: > { %p13_p9 = scmp.ge.s32.totalorder %s881_s17, 4   ;;  %s1059_s12 = smov %s828_s13 }
 0x127   : > { %s1060_s13 = smov %s832_s14  ;;  %s1061_s14 = smov %s891_s20 }
 0x128   : > { %s1062_s15 = smov %s881_s17  ;;  %15 = sbr.rel (!%p13_p9) target bundleno = 3 (0x3), region = 72 }
 0x12d   :  { %545 = vsyncpa [#allocation3], 1 }
 0x12e   :  { %547 = vsyncpa [#allocation3 + $0x1], 1 }

</bundles_post_ra>
